<compile_context>
chip_gen: v7x
topology: tpu7x:2x2x1
jax: 0.10.0
libtpu: 0.0.40
codegen_flags: <defaults>
</compile_context>

<pallas_src>
import jax
import jax.numpy as jnp
from jax.experimental import pallas as pl
from jax.experimental.pallas import tpu as pltpu

_ROW_Q = 16  # batch-row quantum: multiple of 8 sublanes, bf16 packs 16 rows/vreg


def _round_up(x, m):
    return ((x + m - 1) // m) * m


def _pick_tile(batch, max_tile=1024, min_split=256):
    """Choose the batch tile: few, fat steps (grid-step overhead dominates at
    this size), >= 2 tiles for v7x's two TensorCores when each half still
    keeps the MXU well fed (>= min_split rows)."""
    b = _round_up(max(batch, 1), _ROW_Q)
    if b >= 2 * max_tile:
        return max_tile
    half = _round_up(-(-b // 2), _ROW_Q)
    if half >= min_split:
        return half
    return min(b, max_tile)


def _critic_kernel(s_ref, a_ref, w1s_ref, w1a_ref, b1_ref,
                   w2_ref, b2_ref, w3_ref, b3_ref, o_ref):
    # Layer 1 (fused concat -> Linear -> ReLU).  bf16 operands, f32 accumulate.
    h1 = jnp.dot(s_ref[...], w1s_ref[...], preferred_element_type=jnp.float32)
    h1 = h1 + jnp.dot(a_ref[...], w1a_ref[...],
                      preferred_element_type=jnp.float32)
    h1 = jnp.maximum(h1 + b1_ref[...], 0.0)                     # f32 bias+ReLU

    # Layer 2: bf16 matmul, f32 accumulate / bias / ReLU.
    h2 = jnp.dot(h1.astype(jnp.bfloat16), w2_ref[...],
                 preferred_element_type=jnp.float32)
    h2 = jnp.maximum(h2 + b2_ref[...], 0.0)

    # Head: (1, H) @ (H, tile_b) -> lane-dense (1, tile_b) row of Q values.
    q_row = jnp.dot(w3_ref[...], h2.T, preferred_element_type=jnp.float32)
    q_row = q_row + b3_ref[...]                                  # b3 is (1, 1)
    o_ref[...] = q_row[None].astype(o_ref.dtype)                 # (1, 1, tile_b)


def critic_forward(state, action, params, *, tile_b=None):
    """Pallas equivalent of CriticNetwork.forward(state, action) -> (B, 1)."""
    w1_s, w1_a, b1, w2, b2, w3, b3 = params
    B, obs_dim = state.shape
    action_dim = action.shape[1]
    H = w1_s.shape[1]

    bf16, f32 = jnp.bfloat16, jnp.float32
    # Matmul operands in bf16 (MXU-native on v5e/v6e/v7x, half the DMA bytes);
    # biases and head weight stay f32.
    state_b = state.astype(bf16)
    action_b = action.astype(bf16)
    w1_s, w1_a, w2 = w1_s.astype(bf16), w1_a.astype(bf16), w2.astype(bf16)
    b1, b2 = b1.astype(f32), b2.astype(f32)
    w3, b3 = w3.astype(f32), b3.astype(f32)

    if tile_b is None:
        tile_b = _pick_tile(B)
    tile_b = _round_up(max(_ROW_Q, min(tile_b, _round_up(B, _ROW_Q))), _ROW_Q)
    b_pad = _round_up(B, tile_b)
    n_tiles = b_pad // tile_b
    if b_pad != B:
        state_b = jnp.pad(state_b, ((0, b_pad - B), (0, 0)))
        action_b = jnp.pad(action_b, ((0, b_pad - B), (0, 0)))

    # Streamed activation tiles vs. VMEM-resident (single-buffered) weights.
    stream = lambda shape: pl.BlockSpec(shape, lambda i: (i, 0))
    resident = lambda shape: pl.BlockSpec(shape, lambda i: (0, 0),
                                          pipeline_mode=pl.Buffered(1))

    out = pl.pallas_call(
        _critic_kernel,
        out_shape=jax.ShapeDtypeStruct((n_tiles, 1, tile_b), jnp.float32),
        grid=(n_tiles,),
        in_specs=[
            stream((tile_b, obs_dim)),
            stream((tile_b, action_dim)),
            resident((obs_dim, H)), resident((action_dim, H)), resident((1, H)),
            resident((H, H)), resident((1, H)),
            resident((1, H)), resident((1, 1)),
        ],
        out_specs=pl.BlockSpec((1, 1, tile_b), lambda i: (i, 0, 0)),
        compiler_params=pltpu.CompilerParams(
            dimension_semantics=("parallel",)),
    )(state_b, action_b, w1_s, w1_a, b1, w2, b2, w3, b3)

    q = out.reshape(b_pad, 1)
    return q[:B] if b_pad != B else q


def init_params(key, obs_dim, action_dim, hidden_dim):
    """nn.Linear-style U(-1/sqrt(fan_in), 1/sqrt(fan_in)) init, in the kernel
    layout: W1 pre-split along the input axis, W3 as a (1, H) row.  The big
    matrices are stored bf16 (kernel matmul operand dtype)."""
    d_in = obs_dim + action_dim
    ks = jax.random.split(key, 6)

    def uniform(k, shape, fan_in):
        bound = 1.0 / jnp.sqrt(jnp.float32(fan_in))
        return jax.random.uniform(k, shape, jnp.float32, -bound, bound)

    w1 = uniform(ks[0], (d_in, hidden_dim), d_in)
    w1_s = w1[:obs_dim].astype(jnp.bfloat16)
    w1_a = w1[obs_dim:].astype(jnp.bfloat16)
    b1 = uniform(ks[1], (1, hidden_dim), d_in)
    w2 = uniform(ks[2], (hidden_dim, hidden_dim), hidden_dim).astype(jnp.bfloat16)
    b2 = uniform(ks[3], (1, hidden_dim), hidden_dim)
    w3 = uniform(ks[4], (1, hidden_dim), hidden_dim)      # row layout for head
    b3 = uniform(ks[5], (1, 1), hidden_dim)
    return (w1_s, w1_a, b1, w2, b2, w3, b3)


def reference_forward(state, action, params):
    """Pure-JAX reference mirroring the kernel's bf16 operand rounding."""
    w1_s, w1_a, b1, w2, b2, w3, b3 = params
    f32, bf16 = jnp.float32, jnp.bfloat16
    rnd = lambda a: a.astype(bf16).astype(f32)
    x = jnp.concatenate([rnd(state), rnd(action)], axis=1)
    w1 = jnp.concatenate([rnd(w1_s), rnd(w1_a)], axis=0)
    h1 = jax.nn.relu(x @ w1 + b1.astype(f32))
    h2 = jax.nn.relu(rnd(h1) @ rnd(w2) + b2.astype(f32))
    return h2 @ w3.astype(f32).T + b3.astype(f32)


if __name__ == "__main__":
    obs_dim, action_dim, hidden_dim = 16, 8, 128
    batch = 512   # -> two 256-row tiles (exercises multi-step + v7x sharding)

    key = jax.random.PRNGKey(0)
    k_s, k_a, k_p = jax.random.split(key, 3)

    state = jax.random.normal(k_s, (batch, obs_dim), jnp.float32)
    action = jax.random.normal(k_a, (batch, action_dim), jnp.float32)
    params = init_params(k_p, obs_dim, action_dim, hidden_dim)

    q = critic_forward(state, action, params)
    jax.block_until_ready(q)

    q_ref = reference_forward(state, action, params)
    assert q.shape == (batch, 1), q.shape
    err = float(jnp.max(jnp.abs(q - q_ref)))
    assert jnp.allclose(q, q_ref, atol=2e-3, rtol=2e-3), err

    # Exercise the padding / single-tile path as well.
    q_small = critic_forward(state[:50], action[:50], params)
    jax.block_until_ready(q_small)
    assert q_small.shape == (50, 1), q_small.shape
    assert jnp.allclose(q_small, q_ref[:50], atol=2e-3, rtol=2e-3)

    print("KERNEL_OK")
</pallas_src>

<mosaic_0001>
module attributes {stable_mosaic.version = 11 : i64} {
  func.func @_critic_kernel(%arg0: i32, %arg1: memref<256x16xbf16, #tpu.memory_space<vmem>>, %arg2: memref<256x8xbf16, #tpu.memory_space<vmem>>, %arg3: memref<16x128xbf16, #tpu.memory_space<vmem>>, %arg4: memref<8x128xbf16, #tpu.memory_space<vmem>>, %arg5: memref<1x128xf32, #tpu.memory_space<vmem>>, %arg6: memref<128x128xbf16, #tpu.memory_space<vmem>>, %arg7: memref<1x128xf32, #tpu.memory_space<vmem>>, %arg8: memref<1x128xf32, #tpu.memory_space<vmem>>, %arg9: memref<1x1xf32, #tpu.memory_space<vmem>>, %arg10: memref<1x1x256xf32, #tpu.memory_space<vmem>>) attributes {dimension_semantics = [#tpu.dimension_semantics<parallel>], iteration_bounds = array<i64: 2>, scalar_prefetch = 0 : i64, scratch_operands = 0 : i64, tpu.core_type = #tpu.core_type<tc>, window_params = [{transform_indices = @transform_0, window_bounds = array<i64: 256, 16>}, {transform_indices = @transform_1, window_bounds = array<i64: 256, 8>}, {pipeline_mode = #tpu.pipeline_mode<synchronous>, transform_indices = @transform_2, window_bounds = array<i64: 16, 128>}, {pipeline_mode = #tpu.pipeline_mode<synchronous>, transform_indices = @transform_3, window_bounds = array<i64: 8, 128>}, {pipeline_mode = #tpu.pipeline_mode<synchronous>, transform_indices = @transform_4, window_bounds = array<i64: 1, 128>}, {pipeline_mode = #tpu.pipeline_mode<synchronous>, transform_indices = @transform_5, window_bounds = array<i64: 128, 128>}, {pipeline_mode = #tpu.pipeline_mode<synchronous>, transform_indices = @transform_6, window_bounds = array<i64: 1, 128>}, {pipeline_mode = #tpu.pipeline_mode<synchronous>, transform_indices = @transform_7, window_bounds = array<i64: 1, 128>}, {pipeline_mode = #tpu.pipeline_mode<synchronous>, transform_indices = @transform_8, window_bounds = array<i64: 1, 1>}, {transform_indices = @transform_9, window_bounds = array<i64: 1, 1, 256>}]} {
    %c0 = arith.constant 0 : index
    %c0_0 = arith.constant 0 : index
    %0 = vector.load %arg1[%c0, %c0_0] : memref<256x16xbf16, #tpu.memory_space<vmem>>, vector<256x16xbf16>
    %c0_1 = arith.constant 0 : index
    %c0_2 = arith.constant 0 : index
    %1 = vector.load %arg3[%c0_1, %c0_2] : memref<16x128xbf16, #tpu.memory_space<vmem>>, vector<16x128xbf16>
    %cst = arith.constant dense<0.000000e+00> : vector<256x128xf32>
    %2 = tpu.matmul %0, %1, %cst {dimension_numbers = #tpu.dot_dimension_numbers<[1], [0], [0], [1], [0, 0, 1, 1], [], []>} : vector<256x16xbf16>, vector<16x128xbf16>, vector<256x128xf32> -> vector<256x128xf32>
    %c0_3 = arith.constant 0 : index
    %c0_4 = arith.constant 0 : index
    %3 = vector.load %arg2[%c0_3, %c0_4] : memref<256x8xbf16, #tpu.memory_space<vmem>>, vector<256x8xbf16>
    %c0_5 = arith.constant 0 : index
    %c0_6 = arith.constant 0 : index
    %4 = vector.load %arg4[%c0_5, %c0_6] : memref<8x128xbf16, #tpu.memory_space<vmem>>, vector<8x128xbf16>
    %cst_7 = arith.constant dense<0.000000e+00> : vector<256x128xf32>
    %5 = tpu.matmul %3, %4, %cst_7 {dimension_numbers = #tpu.dot_dimension_numbers<[1], [0], [0], [1], [0, 0, 1, 1], [], []>} : vector<256x8xbf16>, vector<8x128xbf16>, vector<256x128xf32> -> vector<256x128xf32>
    %6 = arith.addf %2, %5 : vector<256x128xf32>
    %c0_8 = arith.constant 0 : index
    %c0_9 = arith.constant 0 : index
    %7 = vector.load %arg5[%c0_8, %c0_9] : memref<1x128xf32, #tpu.memory_space<vmem>>, vector<1x128xf32>
    %8 = vector.broadcast %7 : vector<1x128xf32> to vector<256x128xf32>
    %9 = arith.addf %6, %8 : vector<256x128xf32>
    %cst_10 = arith.constant 0.000000e+00 : f32
    %10 = vector.broadcast %cst_10 : f32 to vector<256x128xf32>
    %11 = arith.maximumf %9, %10 : vector<256x128xf32>
    %12 = arith.truncf %11 : vector<256x128xf32> to vector<256x128xbf16>
    %c0_11 = arith.constant 0 : index
    %c0_12 = arith.constant 0 : index
    %13 = vector.load %arg6[%c0_11, %c0_12] : memref<128x128xbf16, #tpu.memory_space<vmem>>, vector<128x128xbf16>
    %cst_13 = arith.constant dense<0.000000e+00> : vector<256x128xf32>
    %14 = tpu.matmul %12, %13, %cst_13 {dimension_numbers = #tpu.dot_dimension_numbers<[1], [0], [0], [1], [0, 0, 1, 1], [], []>} : vector<256x128xbf16>, vector<128x128xbf16>, vector<256x128xf32> -> vector<256x128xf32>
    %c0_14 = arith.constant 0 : index
    %c0_15 = arith.constant 0 : index
    %15 = vector.load %arg7[%c0_14, %c0_15] : memref<1x128xf32, #tpu.memory_space<vmem>>, vector<1x128xf32>
    %16 = vector.broadcast %15 : vector<1x128xf32> to vector<256x128xf32>
    %17 = arith.addf %14, %16 : vector<256x128xf32>
    %cst_16 = arith.constant 0.000000e+00 : f32
    %18 = vector.broadcast %cst_16 : f32 to vector<256x128xf32>
    %19 = arith.maximumf %17, %18 : vector<256x128xf32>
    %c0_17 = arith.constant 0 : index
    %c0_18 = arith.constant 0 : index
    %20 = vector.load %arg8[%c0_17, %c0_18] : memref<1x128xf32, #tpu.memory_space<vmem>>, vector<1x128xf32>
    %21 = tpu.transpose %19, [1, 0] : vector<256x128xf32> -> vector<128x256xf32>
    %cst_19 = arith.constant dense<0.000000e+00> : vector<1x256xf32>
    %22 = tpu.matmul %20, %21, %cst_19 {dimension_numbers = #tpu.dot_dimension_numbers<[1], [0], [0], [1], [0, 0, 1, 1], [], []>} : vector<1x128xf32>, vector<128x256xf32>, vector<1x256xf32> -> vector<1x256xf32>
    %c0_20 = arith.constant 0 : index
    %c0_21 = arith.constant 0 : index
    %23 = vector.load %arg9[%c0_20, %c0_21] : memref<1x1xf32, #tpu.memory_space<vmem>>, vector<1x1xf32>
    %24 = vector.broadcast %23 : vector<1x1xf32> to vector<1x256xf32>
    %25 = arith.addf %22, %24 : vector<1x256xf32>
    %26 = vector.shape_cast %25 : vector<1x256xf32> to vector<1x1x256xf32>
    %c0_22 = arith.constant 0 : index
    %c0_23 = arith.constant 0 : index
    %c0_24 = arith.constant 0 : index
    %27 = vector.load %arg10[%c0_22, %c0_23, %c0_24] : memref<1x1x256xf32, #tpu.memory_space<vmem>>, vector<1x1x256xf32>
    tpu.vector_store %arg10[%c0_22, %c0_23, %c0_24], %26 {strides = array<i32>} : memref<1x1x256xf32, #tpu.memory_space<vmem>>, vector<1x1x256xf32>,
    return
  }
  func.func @transform_0(%arg0: i32) -> (i32, i32) {
    %c0_i32 = arith.constant 0 : i32
    %c0_i32_0 = arith.constant 0 : i32
    return %arg0, %c0_i32 : i32, i32
  }
  func.func @transform_1(%arg0: i32) -> (i32, i32) {
    %c0_i32 = arith.constant 0 : i32
    %c0_i32_0 = arith.constant 0 : i32
    return %arg0, %c0_i32 : i32, i32
  }
  func.func @transform_2(%arg0: i32) -> (i32, i32) {
    %c0_i32 = arith.constant 0 : i32
    %c0_i32_0 = arith.constant 0 : i32
    %c0_i32_1 = arith.constant 0 : i32
    return %c0_i32, %c0_i32_0 : i32, i32
  }
  func.func @transform_3(%arg0: i32) -> (i32, i32) {
    %c0_i32 = arith.constant 0 : i32
    %c0_i32_0 = arith.constant 0 : i32
    %c0_i32_1 = arith.constant 0 : i32
    return %c0_i32, %c0_i32_0 : i32, i32
  }
  func.func @transform_4(%arg0: i32) -> (i32, i32) {
    %c0_i32 = arith.constant 0 : i32
    %c0_i32_0 = arith.constant 0 : i32
    %c0_i32_1 = arith.constant 0 : i32
    return %c0_i32, %c0_i32_0 : i32, i32
  }
  func.func @transform_5(%arg0: i32) -> (i32, i32) {
    %c0_i32 = arith.constant 0 : i32
    %c0_i32_0 = arith.constant 0 : i32
    %c0_i32_1 = arith.constant 0 : i32
    return %c0_i32, %c0_i32_0 : i32, i32
  }
  func.func @transform_6(%arg0: i32) -> (i32, i32) {
    %c0_i32 = arith.constant 0 : i32
    %c0_i32_0 = arith.constant 0 : i32
    %c0_i32_1 = arith.constant 0 : i32
    return %c0_i32, %c0_i32_0 : i32, i32
  }
  func.func @transform_7(%arg0: i32) -> (i32, i32) {
    %c0_i32 = arith.constant 0 : i32
    %c0_i32_0 = arith.constant 0 : i32
    %c0_i32_1 = arith.constant 0 : i32
    return %c0_i32, %c0_i32_0 : i32, i32
  }
  func.func @transform_8(%arg0: i32) -> (i32, i32) {
    %c0_i32 = arith.constant 0 : i32
    %c0_i32_0 = arith.constant 0 : i32
    %c0_i32_1 = arith.constant 0 : i32
    return %c0_i32, %c0_i32_0 : i32, i32
  }
  func.func @transform_9(%arg0: i32) -> (i32, i32, i32) {
    %c0_i32 = arith.constant 0 : i32
    %c0_i32_0 = arith.constant 0 : i32
    %c0_i32_1 = arith.constant 0 : i32
    return %arg0, %c0_i32, %c0_i32_0 : i32, i32, i32
  }
}

</mosaic_0001>

<bundles_post_ra>
// kernel: tpu_custom_call.1
= control target key start
LH: loop header
LB: loop body
LE: loop exit
PB: predicated region body
PF: predicated region fallthrough
CT: control target
= control target key end

     0   :  { %s2479_s0 = inlined_call_operand.vmem [shape: bf16[512,16], index: 0, kind: input, shape index: {}]   ;;  %s2480_s1 = inlined_call_operand.vmem [shape: bf16[512,8], index: 1, kind: input, shape index: {}]   ;;  %s2481_s2 = inlined_call_operand.vmem [shape: bf16[16,128], index: 2, kind: input, shape index: {}]   ;;  %s2482_s3 = inlined_call_operand.vmem [shape: bf16[8,128], index: 3, kind: input, shape index: {}]   ;;  %s2483_s4 = inlined_call_operand.vmem [shape: f32[1,128], index: 4, kind: input, shape index: {}]   ;;  %s2484_s5 = inlined_call_operand.vmem [shape: bf16[128,128], index: 5, kind: input, shape index: {}]   ;;  %s2485_s6 = inlined_call_operand.vmem [shape: f32[1,128], index: 6, kind: input, shape index: {}]   ;;  %s2486_s7 = inlined_call_operand.vmem [shape: f32[1,128], index: 7, kind: input, shape index: {}]   ;;  %s2487_s8 = inlined_call_operand.<no memory space> [shape: f32[1,1], index: 8, kind: input, shape index: {}]   ;;  %s2488_s9 = inlined_call_operand.hbm [shape: f32[2,1,256], index: 9, kind: output, shape index: {}]  }
   0x1   :  { %v14_v0 = vstv %s2487_s8 }
   0x2   :  { %15 = vst [vmem:[#allocation2] sm:$0x1] %v14_v0 }
   0x3   :  { %16 = vsyncpa [#allocation4], 0 }
   0x4   :  { %18 = vsyncpa [#allocation4 + $0x1], 0  ;;  %s2126_s11 = smov 0   ;;  %s2128_s12 = smov 0  }
   0x5   :  { %s2130_s13 = smov 0   ;;  %s2132_s14 = smov 0  }
   0x6 LB: > { %s1556_s8 = sadd.s32 4294967295, %s2068_s14   ;;  %s1557_s15 = sadd.s32 4294967294, %s2068_s14   ;;  %s2068_s14 = sphi %s2132_s14, %s2494_s14   ;;  %s2064_s13 = sphi %s2130_s13, %s2493_s13   ;;  %s2060_s12 = sphi %s2128_s12, %s2492_s12   ;;  %s2056_s11 = sphi %s2126_s11, %s2491_s11  }
   0x7   : > { %s2149_s16 = sadd.s32 1, %s2068_s14   ;;  %s230_s17 = sadd.s32 1, %s2064_s13 }
   0x8   : > { %s227_s18 = ssub.s32 %s2068_s14, %s2149_s16  ;;  %p240_p0 = scmp.ne.s32.totalorder %s2064_s13, %s2060_s12 }
   0x9   : > { %p228_p1 = scmp.eq.s32.totalorder %s227_s18, 0  ;;  %p241_p2 = scmp.eq.s32.totalorder %s1556_s8, 1 }
   0xa   : > { %p246_p3 = scmp.ne.s32.totalorder %s2060_s12, %s2056_s11  ;;  %p247_p4 = scmp.eq.s32.totalorder %s1557_s15, 1 }
   0xb   : > { %s2159_s19 = scalar_select %p228_p1, %s2064_s13, %s230_s17  }
   0xc   : > { %p2161_p5 = por %p241_p2, %p240_p0  ;;  %p2165_p6 = por %p247_p4, %p246_p3 }
   0xd   : > { %p1560_p7 = scmp.ge.s32.totalorder %s2068_s14, 1  ;;  %p304_p8 = scmp.lt.s32.totalorder %s2068_s14, 3 }
   0xf   : > { %p305_p9 = pnand %p1560_p7, %p304_p8 }
  0x10   : > { %v424_v1 = vld [vmem:[%s2482_s3] sm:$0xf] (!%p305_p9)  ;;  %vm554_vm0 = vcmask (!%p305_p9), 1043456   ;;  %s2174_s24 = sshll.u32 (!%p305_p9), %s1556_s8, 5  ;;  %vm505_vm1 = vcmask (!%p305_p9), 64512   ;;  %v1999_v12 = vld [vmem:[%s2484_s5 + $0x8] sm:$0xff] (!%p305_p9)  }
  0x11   : > { %308 = sbr.rel (%p305_p9) target bundleno = 838 (0x346), region = 56  ;;  %v1967_v2 = vld [vmem:[%s2481_s2] sm:$0xff] (!%p305_p9)   ;;  %1921 = vmatprep.subr.msk.bf16.mxu0 (!%p305_p9), %vm554_vm0, %v424_v1  ;;  %v556_v3 = vsel (!%p305_p9), %vm554_vm0, %v424_v1, 0  ;;  %p346_p10 = scmp.lt.s32.totalorder (!%p305_p9), %s2174_s24, 63  ;;  %1922 = vmatprep.subr.msk.bf16.mxu1 (!%p305_p9), %vm554_vm0, %v424_v1  ;;  %v2000_v15 = vld [vmem:[%s2484_s5 + $0x10] sm:$0xff] (!%p305_p9)   ;;  %vm805_vm2 = vcmask (!%p305_p9), 130048  }
  0x12   : > { %1740 = vmatpush3.bf16.msra.mxu0 (!%p305_p9), %v556_v3  ;;  %1888 = vmatpush3.bf16.msra.mxu1 (!%p305_p9), %v556_v3  ;;  %v1998_v4 = vld [vmem:[%s2484_s5] sm:$0xff] (!%p305_p9)   ;;  %v2001_v21 = vld [vmem:[%s2484_s5 + $0x18] sm:$0xff] (!%p305_p9)   ;;  %v2003_v27 = vld [vmem:[%s2484_s5 + $0x28] sm:$0xff] (!%p305_p9)   ;;  %s342_s10 = sand.u32 (!%p305_p9), 1, %s2060_s12   ;;  %s2437_s25 = scalar_lea.hbm (!%p305_p9), %s2488_s9, %s2174_s24 }
  0x13   : > { %1773 = vmatprep.subr.bf16.mxu0 (!%p305_p9), %v1967_v2  ;;  %1807 = vmatprep.subr.bf16.mxu1 (!%p305_p9), %v1998_v4  ;;  %v2002_v22 = vld [vmem:[%s2484_s5 + $0x20] sm:$0xff] (!%p305_p9)   ;;  %v2004_v42 = vld [vmem:[%s2484_s5 + $0x30] sm:$0xff] (!%p305_p9)   ;;  %v2005_v43 = vld [vmem:[%s2484_s5 + $0x38] sm:$0xff] (!%p305_p9)   ;;  %s1561_s8 = sshll.u32 (!%p305_p9), %s342_s10, 1  ;;  %s2072_s27 = smov (!%p305_p9), [#allocation3]  }
  0x14   : > { %v2298_v52 = vld [vmem:[%s2483_s4] ss:$0 sm:$0xff] (!%p305_p9)  ;;  %s344_s17 = scalar_lea.vmem (!%p305_p9), [#allocation3], %s1561_s8  ;;  %s2010_s28 = sshll.u32 (!%p305_p9), %s2072_s27, 4  ;;  %s2011_s28 = int_to_ptr.vmem [resolvable:$false] %s2010_s28 }
  0x18   : > { %s347_s29 = scalar_select %p346_p10, %s2174_s24, 63 }
  0x1a   : > { %s1563_s30 = sshll.u32 %s347_s29, 2  ;;  %s2012_s29 = scalar_lea.vmem %s2011_s28, 64 }
  0x1b   : > { %s2187_s15 = scalar_lea.vmem %s2480_s1, %s1563_s30  ;;  %s2198_s22 = scalar_lea.vmem %s2479_s0, %s1563_s30 }
  0x1c   : > { %v1965_v5 = vld [vmem:[%s2187_s15] sm:$0xff]   ;;  %v1966_v6 = vld [vmem:[%s2187_s15 + $0x8] sm:$0xff]   ;;  %v1968_v7 = vld [vmem:[%s2187_s15 + $0x10] sm:$0xff]  }
  0x1d   : > { %1741 = vmatprep.mubr.msk.bf16.mxu0 %vm505_vm1, %v1965_v5  ;;  %v1969_v8 = vld [vmem:[%s2187_s15 + $0x18] sm:$0xff]   ;;  %v1970_v9 = vld [vmem:[%s2187_s15 + $0x20] sm:$0xff]   ;;  %v1971_v10 = vld [vmem:[%s2187_s15 + $0x28] sm:$0xff]  }
  0x1e   : > { %1742 = vmatmul.mubr.msk.bf16.vlgmr.msra.gmra.mrb[0].mxu0 %vm505_vm1, %v1966_v6  ;;  %v1972_v11 = vld [vmem:[%s2187_s15 + $0x30] sm:$0xff]   ;;  %v1982_v13 = vld [vmem:[%s2187_s15 + $0x40] sm:$0xff]   ;;  %v1983_v14 = vld [vmem:[%s2187_s15 + $0x48] sm:$0xff]  }
  0x1f   : > { %1774 = vmatpush3.bf16.msra.mxu0 %v1967_v2  ;;  %1745 = vmatprep.mubr.msk.bf16.mxu0 %vm505_vm1, %v1968_v7  ;;  %v1986_v16 = vld [vmem:[%s2187_s15 + $0x50] sm:$0xff]   ;;  %v1973_v17 = vld [vmem:[%s2187_s15 + $0x38] sm:$0xff]   ;;  %v1974_v18 = vld [vmem:[%s2198_s22] sm:$0xff]  }
  0x20   : > { %1757 = vmatprep.mubr.msk.bf16.mxu1 %vm505_vm1, %v1982_v13  ;;  %v1988_v19 = vld [vmem:[%s2187_s15 + $0x58] sm:$0xff]   ;;  %v1990_v20 = vld [vmem:[%s2187_s15 + $0x60] sm:$0xff]   ;;  %v1975_v23 = vld [vmem:[%s2198_s22 + $0x8] sm:$0xff]  }
  0x21   : > { %1758 = vmatmul.mubr.msk.bf16.vlgmr.msra.gmra.mrb[0].mxu1 %vm505_vm1, %v1983_v14  ;;  %v1976_v24 = vld [vmem:[%s2198_s22 + $0x10] sm:$0xff]   ;;  %v1992_v25 = vld [vmem:[%s2187_s15 + $0x68] sm:$0xff]   ;;  %v1977_v28 = vld [vmem:[%s2198_s22 + $0x18] sm:$0xff]  }
  0x22   : > { %1808 = vmatpush3.bf16.msra.mxu1 %v1998_v4  ;;  %1761 = vmatprep.mubr.msk.bf16.mxu1 %vm505_vm1, %v1986_v16  ;;  %v1994_v26 = vld [vmem:[%s2187_s15 + $0x70] sm:$0xff]   ;;  %v1996_v29 = vld [vmem:[%s2187_s15 + $0x78] sm:$0xff]   ;;  %v1978_v30 = vld [vmem:[%s2198_s22 + $0x20] sm:$0xff]   ;;  %s1486_s15 = sshll.u32 %s344_s17, 4  ;;  %s2439_s15 = int_to_ptr.vmem [resolvable:$true] %s1486_s15 }
  0x23   : > { %1809 = vmatprep.subr.bf16.mxu1 %v1999_v12  ;;  %v1979_v31 = vld [vmem:[%s2198_s22 + $0x28] sm:$0xff]   ;;  %v1980_v32 = vld [vmem:[%s2198_s22 + $0x30] sm:$0xff]   ;;  %v1981_v33 = vld [vmem:[%s2198_s22 + $0x38] sm:$0xff]   ;;  %s2006_s26 = scalar_lea.vmem %s2439_s15, 32  ;;  %p2013_p0 = scmp.lt.s32.totalorder %s2439_s15, %s2011_s28 }
  0x24   : > { %v1984_v34 = vld [vmem:[%s2198_s22 + $0x40] sm:$0xff]   ;;  %v1985_v35 = vld [vmem:[%s2198_s22 + $0x48] sm:$0xff]   ;;  %v1987_v36 = vld [vmem:[%s2198_s22 + $0x50] sm:$0xff]   ;;  %p2007_p11 = scmp.ne.s32.totalorder %s2439_s15, %s2006_s26  ;;  %p2014_p1 = scmp.lt.s32.totalorder %s2012_s29, %s2006_s26 }
  0x25   : > { %v1989_v37 = vld [vmem:[%s2198_s22 + $0x58] sm:$0xff]   ;;  %v1991_v38 = vld [vmem:[%s2198_s22 + $0x60] sm:$0xff]   ;;  %v1993_v39 = vld [vmem:[%s2198_s22 + $0x68] sm:$0xff]  }
  0x26   : > { %1746 = vmatmul.mubr.msk.bf16.gmra.mrb[4].mxu0 %vm505_vm1, %v1969_v8  ;;  %1810 = vmatpush3.bf16.msra.mxu1 %v1999_v12  ;;  %v1995_v40 = vld [vmem:[%s2198_s22 + $0x70] sm:$0xff]   ;;  %v1997_v41 = vld [vmem:[%s2198_s22 + $0x78] sm:$0xff]   ;;  %s1472_s22 = scalar_lea.sflag [#allocation4], %s342_s10  ;;  %p2008_p12 = pnand %p2007_p11, %p2161_p5 }
  0x27   : > { %1749 = vmatprep.mubr.msk.bf16.mxu0 %vm505_vm1, %v1970_v9  ;;  %1811 = vmatprep.subr.bf16.mxu1 %v2000_v15  ;;  %p2015_p2 = por %p2014_p1, %p2013_p0 }
  0x28   : > { %p2009_p13 = pneg %p2008_p12 }
  0x29   : > { %1762 = vmatmul.mubr.msk.bf16.gmra.mrb[4].mxu1 %vm505_vm1, %v1988_v19 }
  0x2a   : > { %1765 = vmatprep.mubr.msk.bf16.mxu1 %vm505_vm1, %v1990_v20  ;;  %1812 = vmatpush3.bf16.msra.mxu1 %v2000_v15  ;;  %p2016_p3 = pnand %p2015_p2, %p2009_p13 }
  0x2b   : > { %1813 = vmatprep.subr.bf16.mxu1 %v2001_v21 }
  0x2e   : > { %1750 = vmatmul.mubr.msk.bf16.gmra.mrb[8].mxu0 %vm505_vm1, %v1971_v10  ;;  %1814 = vmatpush3.bf16.msra.mxu1 %v2001_v21 }
  0x2f   : > { %1753 = vmatprep.mubr.msk.bf16.mxu0 %vm505_vm1, %v1972_v11  ;;  %1815 = vmatprep.subr.bf16.mxu1 %v2002_v22 }
  0x31   : > { %1766 = vmatmul.mubr.msk.bf16.gmra.mrb[8].mxu1 %vm505_vm1, %v1992_v25 }
  0x32   : > { %1769 = vmatprep.mubr.msk.bf16.mxu1 %vm505_vm1, %v1994_v26  ;;  %1816 = vmatpush3.bf16.msra.mxu1 %v2002_v22 }
  0x33   : > { %1817 = vmatprep.subr.bf16.mxu1 %v2003_v27 }
  0x36   : > { %1754 = vmatmul.mubr.msk.bf16.gmra.mrb[12].mxu0 %vm505_vm1, %v1973_v17  ;;  %1818 = vmatpush3.bf16.msra.mxu1 %v2003_v27 }
  0x37   : > { %1775 = vmatprep.mubr.msk.bf16.mxu0 %vm805_vm2, %v1974_v18  ;;  %1819 = vmatprep.subr.bf16.mxu1 %v2004_v42 }
  0x39   : > { %1770 = vmatmul.mubr.msk.bf16.gmra.mrb[12].mxu1 %vm505_vm1, %v1996_v29 }
  0x3a   : > { %1820 = vmatpush3.bf16.msra.mxu1 %v2004_v42 }
  0x3b   : > { %1821 = vmatprep.subr.bf16.mxu1 %v2005_v43 }
  0x3e   : > { %1776 = vmatmul.mubr.msk.bf16.vlgmr.msra.gmra.mrb[0].mxu0 %vm805_vm2, %v1975_v23  ;;  %1822 = vmatpush3.bf16.msra.mxu1 %v2005_v43 }
  0x3f   : > { %1779 = vmatprep.mubr.msk.bf16.mxu0 %vm805_vm2, %v1976_v24 }
  0x46   : > { %1780 = vmatmul.mubr.msk.bf16.gmra.mrb[4].mxu0 %vm805_vm2, %v1977_v28 }
  0x47   : > { %1783 = vmatprep.mubr.msk.bf16.mxu0 %vm805_vm2, %v1978_v30 }
  0x4e   : > { %1784 = vmatmul.mubr.msk.bf16.gmra.mrb[8].mxu0 %vm805_vm2, %v1979_v31 }
  0x4f   : > { %1787 = vmatprep.mubr.msk.bf16.mxu0 %vm805_vm2, %v1980_v32 }
  0x56   : > { %1788 = vmatmul.mubr.msk.bf16.gmra.mrb[12].mxu0 %vm805_vm2, %v1981_v33 }
  0x57   : > { %1791 = vmatprep.mubr.msk.bf16.mxu0 %vm805_vm2, %v1984_v34 }
  0x5e   : > { %1792 = vmatmul.mubr.msk.bf16.gmra.mrb[16].mxu0 %vm805_vm2, %v1985_v35 }
  0x5f   : > { %1795 = vmatprep.mubr.msk.bf16.mxu0 %vm805_vm2, %v1987_v36 }
  0x66   : > { %1796 = vmatmul.mubr.msk.bf16.gmra.mrb[20].mxu0 %vm805_vm2, %v1989_v37 }
  0x67   : > { %1799 = vmatprep.mubr.msk.bf16.mxu0 %vm805_vm2, %v1991_v38 }
  0x6e   : > { %1800 = vmatmul.mubr.msk.bf16.gmra.mrb[24].mxu0 %vm805_vm2, %v1993_v39 }
  0x6f   : > { %1803 = vmatprep.mubr.msk.bf16.mxu0 %vm805_vm2, %v1995_v40 }
  0x76   : > { %1804 = vmatmul.mubr.msk.bf16.gmra.mrb[28].mxu0 %vm805_vm2, %v1997_v41 }
  0xf4   : > { %v2279_v44 = vpop.f32.mrb[0].mxu1 }
  0xf5   : > { %v2281_v45 = vpop.f32.mrb[1].mxu1 }
  0xf6   : > { %v2283_v46 = vpop.f32.mrb[2].mxu1 }
  0xf7   : > { %v2285_v47 = vpop.f32.mrb[3].mxu1 }
  0xfc   : > { %v2287_v48 = vpop.f32.mrb[4].mxu1 }
  0xfd   : > { %v2289_v49 = vpop.f32.mrb[5].mxu1 }
  0xfe   : > { %v2291_v50 = vpop.f32.mrb[6].mxu1 }
  0xff   : > { %v2293_v51 = vpop.f32.mrb[7].mxu1 }
 0x104   : > { %v2300_v54 = vpop.f32.mrb[8].mxu1 }
 0x105   : > { %v2303_v57 = vpop.f32.mrb[9].mxu1 }
 0x106   : > { %v2306_v60 = vpop.f32.mrb[10].mxu1 }
 0x107   : > { %v2309_v63 = vpop.f32.mrb[11].mxu1 }
 0x10c   : > { %v2312_v8 = vpop.f32.mrb[12].mxu1 }
 0x10d   : > { %v2315_v11 = vpop.f32.mrb[13].mxu1 }
 0x10e   : > { %v2318_v14 = vpop.f32.mrb[14].mxu1 }
 0x10f   : > { %v2321_v17 = vpop.f32.mrb[15].mxu1 }
 0x111   : > { %v1777_v53 = vpop.f32.mrb[0].mxu0 }
 0x112   : > { %v1024_v55 = vadd.f32 %v1777_v53, %v2298_v52  ;;  %v888_v56 = vpop.f32.mrb[1].mxu0 }
 0x113   : > { %v1022_v58 = vadd.f32 %v2298_v52, %v888_v56  ;;  %v1778_v59 = vpop.f32.mrb[2].mxu0 }
 0x114   : > { %v1025_v61 = vadd.f32 %v1778_v59, %v2298_v52  ;;  %v891_v62 = vpop.f32.mrb[3].mxu0  ;;  %v1056_v1 = vmax.f32 %v1024_v55, 0.0 }
 0x115   : > { %v1023_v0 = vadd.f32 %v2298_v52, %v891_v62  ;;  %v1054_v3 = vmax.f32 %v1022_v58, 0.0 }
 0x116   : > { %v1057_v2 = vmax.f32 %v1025_v61, 0.0 }
 0x117   : > { %v1055_v4 = vmax.f32 %v1023_v0, 0.0 }
 0x118   : > { %v1087_v5 = vpack.c.bf16 %v1057_v2, %v1056_v1 }
 0x119   : > { %v1086_v6 = vpack.c.bf16 %v1055_v4, %v1054_v3  ;;  %v1781_v7 = vpop.f32.mrb[4].mxu0 }
 0x11a   : > { %v1028_v9 = vadd.f32 %v1781_v7, %v2298_v52  ;;  %v904_v10 = vpop.f32.mrb[5].mxu0 }
 0x11b   : > { %v1026_v12 = vadd.f32 %v2298_v52, %v904_v10  ;;  %v1782_v13 = vpop.f32.mrb[6].mxu0  ;;  %1823 = vmatprep.mubr.bf16.mxu1 %v1086_v6 }
 0x11c   : > { %v1029_v15 = vadd.f32 %v1782_v13, %v2298_v52  ;;  %v907_v16 = vpop.f32.mrb[7].mxu0  ;;  %1824 = vmatmul.mubr.bf16.vlgmr.msra.gmra.mrb[16].mxu1 %v1087_v5  ;;  %v1060_v19 = vmax.f32 %v1028_v9, 0.0 }
 0x11d   : > { %v1027_v18 = vadd.f32 %v2298_v52, %v907_v16  ;;  %v1058_v21 = vmax.f32 %v1026_v12, 0.0 }
 0x11e   : > { %v1061_v20 = vmax.f32 %v1029_v15, 0.0 }
 0x11f   : > { %v1059_v22 = vmax.f32 %v1027_v18, 0.0 }
 0x120   : > { %v1089_v23 = vpack.c.bf16 %v1061_v20, %v1060_v19 }
 0x121   : > { %v1088_v24 = vpack.c.bf16 %v1059_v22, %v1058_v21  ;;  %v1785_v25 = vpop.f32.mrb[8].mxu0 }
 0x122   : > { %v1032_v26 = vadd.f32 %v1785_v25, %v2298_v52  ;;  %v920_v27 = vpop.f32.mrb[9].mxu0 }
 0x123   : > { %v1030_v28 = vadd.f32 %v2298_v52, %v920_v27  ;;  %v1786_v29 = vpop.f32.mrb[10].mxu0  ;;  %1827 = vmatprep.mubr.bf16.mxu1 %v1088_v24 }
 0x124   : > { %v1033_v30 = vadd.f32 %v1786_v29, %v2298_v52  ;;  %v923_v31 = vpop.f32.mrb[11].mxu0  ;;  %1828 = vmatmul.mubr.bf16.gmra.mrb[20].mxu1 %v1089_v23  ;;  %v1064_v33 = vmax.f32 %v1032_v26, 0.0 }
 0x125   : > { %v1031_v32 = vadd.f32 %v2298_v52, %v923_v31  ;;  %v1062_v35 = vmax.f32 %v1030_v28, 0.0 }
 0x126   : > { %v1065_v34 = vmax.f32 %v1033_v30, 0.0 }
 0x127   : > { %v1063_v36 = vmax.f32 %v1031_v32, 0.0 }
 0x128   : > { %v1091_v37 = vpack.c.bf16 %v1065_v34, %v1064_v33 }
 0x129   : > { %v1090_v38 = vpack.c.bf16 %v1063_v36, %v1062_v35  ;;  %v1789_v39 = vpop.f32.mrb[12].mxu0 }
 0x12a   : > { %v1036_v40 = vadd.f32 %v1789_v39, %v2298_v52  ;;  %v936_v41 = vpop.f32.mrb[13].mxu0 }
 0x12b   : > { %v1034_v42 = vadd.f32 %v2298_v52, %v936_v41  ;;  %v1790_v43 = vpop.f32.mrb[14].mxu0  ;;  %1831 = vmatprep.mubr.bf16.mxu1 %v1090_v38 }
 0x12c   : > { %v1037_v53 = vadd.f32 %v1790_v43, %v2298_v52  ;;  %v939_v55 = vpop.f32.mrb[15].mxu0  ;;  %1832 = vmatmul.mubr.bf16.gmra.mrb[24].mxu1 %v1091_v37  ;;  %v1068_v58 = vmax.f32 %v1036_v40, 0.0 }
 0x12d   : > { %v1035_v56 = vadd.f32 %v2298_v52, %v939_v55  ;;  %v1066_v61 = vmax.f32 %v1034_v42, 0.0 }
 0x12e   : > { %v1069_v59 = vmax.f32 %v1037_v53, 0.0 }
 0x12f   : > { %v1067_v62 = vmax.f32 %v1035_v56, 0.0 }
 0x130   : > { %v1093_v0 = vpack.c.bf16 %v1069_v59, %v1068_v58 }
 0x131   : > { %v1092_v1 = vpack.c.bf16 %v1067_v62, %v1066_v61  ;;  %v1793_v2 = vpop.f32.mrb[16].mxu0 }
 0x132   : > { %v961_v3 = vadd.f32 %v1793_v2, %v2279_v44  ;;  %v952_v4 = vpop.f32.mrb[17].mxu0 }
 0x133   : > { %v953_v5 = vadd.f32 %v952_v4, %v2281_v45  ;;  %v1794_v6 = vpop.f32.mrb[18].mxu0  ;;  %1835 = vmatprep.mubr.bf16.mxu1 %v1092_v1 }
 0x134   : > { %v1040_v7 = vadd.f32 %v2298_v52, %v961_v3  ;;  %v964_v9 = vadd.f32 %v1794_v6, %v2283_v46  ;;  %v955_v10 = vpop.f32.mrb[19].mxu0  ;;  %1836 = vmatmul.mubr.bf16.gmra.mrb[28].mxu1 %v1093_v0 }
 0x135   : > { %v1038_v12 = vadd.f32 %v2298_v52, %v953_v5  ;;  %v956_v13 = vadd.f32 %v955_v10, %v2285_v47 }
 0x136   : > { %v1041_v15 = vadd.f32 %v2298_v52, %v964_v9  ;;  %v1072_v44 = vmax.f32 %v1040_v7, 0.0 }
 0x137   : > { %v1039_v16 = vadd.f32 %v2298_v52, %v956_v13  ;;  %v1070_v19 = vmax.f32 %v1038_v12, 0.0 }
 0x138   : > { %v1073_v18 = vmax.f32 %v1041_v15, 0.0 }
 0x139   : > { %v1071_v45 = vmax.f32 %v1039_v16, 0.0  ;;  %v1797_v20 = vpop.f32.mrb[20].mxu0  ;;  %v2070_v16 = vmov 0  }
 0x13a   : > { %v977_v21 = vadd.f32 %v1797_v20, %v2287_v48  ;;  %v968_v22 = vpop.f32.mrb[21].mxu0  ;;  %v1095_v23 = vpack.c.bf16 %v1073_v18, %v1072_v44  ;;  %1964 = vset.pattern.permute.xlu0 %v2070_v16 }
 0x13b   : > { %v969_v46 = vadd.f32 %v968_v22, %v2289_v49  ;;  %v1798_v24 = vpop.f32.mrb[22].mxu0  ;;  %v1094_v25 = vpack.c.bf16 %v1071_v45, %v1070_v19 }
 0x13c   : > { %v1044_v26 = vadd.f32 %v2298_v52, %v977_v21  ;;  %v980_v47 = vadd.f32 %v1798_v24, %v2291_v50  ;;  %v971_v27 = vpop.f32.mrb[23].mxu0 }
 0x13d   : > { %v1042_v28 = vadd.f32 %v2298_v52, %v969_v46  ;;  %v972_v29 = vadd.f32 %v971_v27, %v2293_v51  ;;  %1839 = vmatprep.mubr.bf16.mxu1 %v1094_v25 }
 0x13e   : > { %v1076_v30 = vmax.f32 %v1044_v26, 0.0  ;;  %v1045_v31 = vadd.f32 %v2298_v52, %v980_v47  ;;  %1840 = vmatmul.mubr.bf16.gmra.mrb[32].mxu1 %v1095_v23 }
 0x13f   : > { %v1074_v48 = vmax.f32 %v1042_v28, 0.0  ;;  %v1043_v32 = vadd.f32 %v2298_v52, %v972_v29 }
 0x140   : > { %v1077_v49 = vmax.f32 %v1045_v31, 0.0 }
 0x141   : > { %v1075_v33 = vmax.f32 %v1043_v32, 0.0  ;;  %v1801_v34 = vpop.f32.mrb[24].mxu0 }
 0x142   : > { %v1097_v35 = vpack.c.bf16 %v1077_v49, %v1076_v30  ;;  %v993_v36 = vadd.f32 %v1801_v34, %v2300_v54  ;;  %v984_v50 = vpop.f32.mrb[25].mxu0 }
 0x143   : > { %v1096_v37 = vpack.c.bf16 %v1075_v33, %v1074_v48  ;;  %v985_v38 = vadd.f32 %v984_v50, %v2303_v57  ;;  %v1802_v39 = vpop.f32.mrb[26].mxu0 }
 0x144   : > { %v1048_v51 = vadd.f32 %v2298_v52, %v993_v36  ;;  %v996_v40 = vadd.f32 %v1802_v39, %v2306_v60  ;;  %v987_v41 = vpop.f32.mrb[27].mxu0 }
 0x145   : > { %1843 = vmatprep.mubr.bf16.mxu1 %v1096_v37  ;;  %v1046_v42 = vadd.f32 %v2298_v52, %v985_v38  ;;  %v988_v43 = vadd.f32 %v987_v41, %v2309_v63 }
 0x146   : > { %1844 = vmatmul.mubr.bf16.gmra.mrb[36].mxu1 %v1097_v35  ;;  %v1080_v53 = vmax.f32 %v1048_v51, 0.0  ;;  %v1049_v55 = vadd.f32 %v2298_v52, %v996_v40 }
 0x147   : > { %v1078_v54 = vmax.f32 %v1046_v42, 0.0  ;;  %v1047_v56 = vadd.f32 %v2298_v52, %v988_v43 }
 0x148   : > { %v1081_v58 = vmax.f32 %v1049_v55, 0.0 }
 0x149   : > { %v1079_v57 = vmax.f32 %v1047_v56, 0.0  ;;  %v1805_v59 = vpop.f32.mrb[28].mxu0 }
 0x14a   : > { %v1099_v61 = vpack.c.bf16 %v1081_v58, %v1080_v53  ;;  %v1009_v62 = vadd.f32 %v1805_v59, %v2312_v8  ;;  %v1000_v60 = vpop.f32.mrb[29].mxu0 }
 0x14b   : > { %v1098_v0 = vpack.c.bf16 %v1079_v57, %v1078_v54  ;;  %v1001_v1 = vadd.f32 %v1000_v60, %v2315_v11  ;;  %v1806_v2 = vpop.f32.mrb[30].mxu0 }
 0x14c   : > { %v1052_v63 = vadd.f32 %v2298_v52, %v1009_v62  ;;  %v1012_v3 = vadd.f32 %v1806_v2, %v2318_v14  ;;  %v1003_v4 = vpop.f32.mrb[31].mxu0  ;;  %v2367_v14 = vld [vmem:[%s2486_s7] sm:$0x1] }
 0x14d   : > { %1847 = vmatprep.mubr.bf16.mxu1 %v1098_v0  ;;  %v1050_v5 = vadd.f32 %v2298_v52, %v1001_v1  ;;  %v1004_v6 = vadd.f32 %v1003_v4, %v2321_v17  ;;  %v1367_v17 = vld [vmem:[#allocation2] sm:$0x1] }
 0x14e   : > { %1848 = vmatmul.mubr.bf16.gmra.mrb[40].mxu1 %v1099_v61  ;;  %v1084_v7 = vmax.f32 %v1052_v63, 0.0  ;;  %v1053_v9 = vadd.f32 %v2298_v52, %v1012_v3  ;;  %1370 = vperm.xlu0 %1964, %v1367_v17  }
 0x14f   : > { %v1082_v8 = vmax.f32 %v1050_v5, 0.0  ;;  %v1051_v10 = vadd.f32 %v2298_v52, %v1004_v6  ;;  %v2373_v52 = vld [vmem:[%s2485_s6] ss:$0 sm:$0xff] }
 0x150   : > { %v1085_v12 = vmax.f32 %v1053_v9, 0.0 }
 0x151   : > { %v1083_v11 = vmax.f32 %v1051_v10, 0.0 }
 0x152   : > { %v1101_v13 = vpack.c.bf16 %v1085_v12, %v1084_v7 }
 0x153   : > { %v1100_v15 = vpack.c.bf16 %v1083_v11, %v1082_v8 }
 0x155   : > { %1851 = vmatprep.mubr.bf16.mxu1 %v1100_v15 }
 0x156   : > { %1852 = vmatmul.mubr.bf16.gmra.mrb[44].mxu1 %v1101_v13 }
 0x157   : > { %1737 = vmatprep.mubr.f32.mxu1 %v2367_v14 }
 0x1ef   : > { %v1825_v44 = vpop.f32.mrb[16].mxu1 }
 0x1f0   : > { %v1216_v18 = vadd.f32 %v1825_v44, %v2373_v52  ;;  %v1207_v19 = vpop.f32.mrb[17].mxu1 }
 0x1f1   : > { %v1208_v45 = vadd.f32 %v2373_v52, %v1207_v19  ;;  %v1826_v20 = vpop.f32.mrb[18].mxu1 }
 0x1f2   : > { %v1219_v21 = vadd.f32 %v1826_v20, %v2373_v52  ;;  %v1210_v22 = vpop.f32.mrb[19].mxu1  ;;  %v1336_v46 = vmax.f32 %v1216_v18, 0.0 }
 0x1f3   : > { %v1211_v23 = vadd.f32 %v2373_v52, %v1210_v22  ;;  %v1334_v25 = vmax.f32 %v1208_v45, 0.0 }
 0x1f4   : > { %v1337_v24 = vmax.f32 %v1219_v21, 0.0 }
 0x1f5   : > { %v1335_v26 = vmax.f32 %v1211_v23, 0.0 }
 0x1f6   : > { %v2379_v47 = vpack.c.bf16 %v1337_v24, %v1336_v46 }
 0x1f7   : > { %v2381_v27 = vpack.c.bf16 %v1335_v26, %v1334_v25  ;;  %v1829_v28 = vpop.f32.mrb[20].mxu1 }
 0x1f8   : > { %v1232_v29 = vadd.f32 %v1829_v28, %v2373_v52  ;;  %v1223_v30 = vpop.f32.mrb[21].mxu1 }
 0x1f9   : > { %v1224_v31 = vadd.f32 %v2373_v52, %v1223_v30  ;;  %v1830_v48 = vpop.f32.mrb[22].mxu1 }
 0x1fa   : > { %v1235_v32 = vadd.f32 %v1830_v48, %v2373_v52  ;;  %v1226_v49 = vpop.f32.mrb[23].mxu1  ;;  %v1340_v34 = vmax.f32 %v1232_v29, 0.0 }
 0x1fb   : > { %v1227_v33 = vadd.f32 %v2373_v52, %v1226_v49  ;;  %v1338_v36 = vmax.f32 %v1224_v31, 0.0 }
 0x1fc   : > { %v1341_v35 = vmax.f32 %v1235_v32, 0.0 }
 0x1fd   : > { %v1339_v50 = vmax.f32 %v1227_v33, 0.0 }
 0x1fe   : > { %v2387_v37 = vpack.c.bf16 %v1341_v35, %v1340_v34 }
 0x1ff   : > { %v2389_v38 = vpack.c.bf16 %v1339_v50, %v1338_v36  ;;  %v1833_v39 = vpop.f32.mrb[24].mxu1 }
 0x200   : > { %v1248_v51 = vadd.f32 %v1833_v39, %v2373_v52  ;;  %v1239_v40 = vpop.f32.mrb[25].mxu1 }
 0x201   : > { %v1240_v41 = vadd.f32 %v2373_v52, %v1239_v40  ;;  %v1834_v42 = vpop.f32.mrb[26].mxu1 }
 0x202   : > { %v1251_v43 = vadd.f32 %v1834_v42, %v2373_v52  ;;  %v1242_v53 = vpop.f32.mrb[27].mxu1  ;;  %v1344_v54 = vmax.f32 %v1248_v51, 0.0 }
 0x203   : > { %v1243_v55 = vadd.f32 %v2373_v52, %v1242_v53  ;;  %v1342_v58 = vmax.f32 %v1240_v41, 0.0 }
 0x204   : > { %v1345_v56 = vmax.f32 %v1251_v43, 0.0 }
 0x205   : > { %v1343_v57 = vmax.f32 %v1243_v55, 0.0 }
 0x206   : > { %v2395_v59 = vpack.c.bf16 %v1345_v56, %v1344_v54 }
 0x207   : > { %v2397_v61 = vpack.c.bf16 %v1343_v57, %v1342_v58  ;;  %v1837_v62 = vpop.f32.mrb[28].mxu1 }
 0x208   : > { %v1264_v60 = vadd.f32 %v1837_v62, %v2373_v52  ;;  %v1255_v0 = vpop.f32.mrb[29].mxu1 }
 0x209   : > { %v1256_v1 = vadd.f32 %v2373_v52, %v1255_v0  ;;  %v1838_v2 = vpop.f32.mrb[30].mxu1 }
 0x20a   : > { %v1267_v63 = vadd.f32 %v1838_v2, %v2373_v52  ;;  %v1258_v3 = vpop.f32.mrb[31].mxu1  ;;  %v1348_v5 = vmax.f32 %v1264_v60, 0.0 }
 0x20b   : > { %v1259_v4 = vadd.f32 %v2373_v52, %v1258_v3  ;;  %v1346_v7 = vmax.f32 %v1256_v1, 0.0 }
 0x20c   : > { %v1349_v6 = vmax.f32 %v1267_v63, 0.0 }
 0x20d   : > { %v1347_v9 = vmax.f32 %v1259_v4, 0.0 }
 0x20e   : > { %v2403_v8 = vpack.c.bf16 %v1349_v6, %v1348_v5 }
 0x20f   : > { %v2405_v10 = vpack.c.bf16 %v1347_v9, %v1346_v7 }
 0x211   : > { %v1841_v12 = vpop.f32.mrb[32].mxu1 }
 0x212   : > { %v1280_v11 = vadd.f32 %v1841_v12, %v2373_v52  ;;  %v1271_v13 = vpop.f32.mrb[33].mxu1 }
 0x213   : > { %v1272_v15 = vadd.f32 %v2373_v52, %v1271_v13  ;;  %v1842_v17 = vpop.f32.mrb[34].mxu1 }
 0x214   : > { %v1283_v16 = vadd.f32 %v1842_v17, %v2373_v52  ;;  %v1274_v44 = vpop.f32.mrb[35].mxu1  ;;  %v1352_v19 = vmax.f32 %v1280_v11, 0.0  ;;  %v1371_v11 = vpop.permute.xlu0 %1370 }
 0x215   : > { %v1275_v18 = vadd.f32 %v2373_v52, %v1274_v44  ;;  %v1350_v20 = vmax.f32 %v1272_v15, 0.0 }
 0x216   : > { %v1353_v45 = vmax.f32 %v1283_v16, 0.0 }
 0x217   : > { %v1351_v21 = vmax.f32 %v1275_v18, 0.0 }
 0x218   : > { %v1859_v22 = vpack.c.bf16 %v1353_v45, %v1352_v19 }
 0x219   : > { %v1855_v23 = vpack.c.bf16 %v1351_v21, %v1350_v20  ;;  %v1845_v46 = vpop.f32.mrb[36].mxu1 }
 0x21a   : > { %v1296_v24 = vadd.f32 %v1845_v46, %v2373_v52  ;;  %v1287_v25 = vpop.f32.mrb[37].mxu1 }
 0x21b   : > { %v1288_v26 = vadd.f32 %v2373_v52, %v1287_v25  ;;  %1856 = vmatprep.subr.bf16.mxu1 %v1855_v23  ;;  %v1846_v28 = vpop.f32.mrb[38].mxu1 }
 0x21c   : > { %v1356_v29 = vmax.f32 %v1296_v24, 0.0  ;;  %v1299_v30 = vadd.f32 %v1846_v28, %v2373_v52  ;;  %1858 = vmatpush3.bf16.xpose.msra.mxu1 %v2381_v27  ;;  %v1290_v31 = vpop.f32.mrb[39].mxu1 }
 0x21d   : > { %v1354_v48 = vmax.f32 %v1288_v26, 0.0  ;;  %v1291_v32 = vadd.f32 %v2373_v52, %v1290_v31  ;;  %1860 = vmatprep.subr.bf16.mxu1 %v1859_v22 }
 0x21e   : > { %v1357_v49 = vmax.f32 %v1299_v30, 0.0 }
 0x21f   : > { %v1355_v33 = vmax.f32 %v1291_v32, 0.0 }
 0x220   : > { %v1867_v34 = vpack.c.bf16 %v1357_v49, %v1356_v29 }
 0x221   : > { %v1863_v35 = vpack.c.bf16 %v1355_v33, %v1354_v48  ;;  %v1849_v36 = vpop.f32.mrb[40].mxu1 }
 0x222   : > { %v1312_v50 = vadd.f32 %v1849_v36, %v2373_v52  ;;  %v1303_v39 = vpop.f32.mrb[41].mxu1 }
 0x223   : > { %v1304_v51 = vadd.f32 %v2373_v52, %v1303_v39  ;;  %v1850_v40 = vpop.f32.mrb[42].mxu1 }
 0x224   : > { %1862 = vmatpush3.bf16.xpose.msra.mxu1 %v2379_v47  ;;  %v1360_v41 = vmax.f32 %v1312_v50, 0.0  ;;  %v1315_v27 = vadd.f32 %v1850_v40, %v2373_v52  ;;  %v1306_v42 = vpop.f32.mrb[43].mxu1 }
 0x225   : > { %1864 = vmatprep.subr.bf16.mxu1 %v1863_v35  ;;  %v1358_v43 = vmax.f32 %v1304_v51, 0.0  ;;  %v1307_v53 = vadd.f32 %v2373_v52, %v1306_v42 }
 0x226   : > { %v1361_v55 = vmax.f32 %v1315_v27, 0.0 }
 0x227   : > { %v1359_v54 = vmax.f32 %v1307_v53, 0.0 }
 0x228   : > { %v1875_v56 = vpack.c.bf16 %v1361_v55, %v1360_v41 }
 0x229   : > { %v1871_v58 = vpack.c.bf16 %v1359_v54, %v1358_v43  ;;  %v1853_v57 = vpop.f32.mrb[44].mxu1 }
 0x22a   : > { %v1328_v62 = vadd.f32 %v1853_v57, %v2373_v52  ;;  %v1319_v60 = vpop.f32.mrb[45].mxu1 }
 0x22b   : > { %v1320_v0 = vadd.f32 %v2373_v52, %v1319_v60  ;;  %v1854_v1 = vpop.f32.mrb[46].mxu1 }
 0x22c   : > { %1866 = vmatpush3.bf16.xpose.msra.mxu1 %v2389_v38  ;;  %v1364_v47 = vmax.f32 %v1328_v62, 0.0  ;;  %v1331_v2 = vadd.f32 %v1854_v1, %v2373_v52  ;;  %v1322_v63 = vpop.f32.mrb[47].mxu1 }
 0x22d   : > { %1868 = vmatprep.subr.bf16.mxu1 %v1867_v34  ;;  %v1362_v3 = vmax.f32 %v1320_v0, 0.0  ;;  %v1323_v4 = vadd.f32 %v2373_v52, %v1322_v63  ;;  %v1373_v52 = vlaneseq }
 0x22e   : > { %v1365_v5 = vmax.f32 %v1331_v2, 0.0 }
 0x22f   : > { %v1363_v6 = vmax.f32 %v1323_v4, 0.0  ;;  %v1374_v38 = vshrl.u32 %v1373_v52, 7  ;;  %vm1468_vm3 = vcmp.lt.s32.totalorder %v1373_v52, 256 }
 0x230   : > { %v1883_v7 = vpack.c.bf16 %v1365_v5, %v1364_v47 }
 0x231   : > { %v1879_v9 = vpack.c.bf16 %v1363_v6, %v1362_v3  ;;  %v1375_v12 = vsub.s32 0, %v1374_v38 }
 0x234   : > { %1870 = vmatpush3.bf16.xpose.msra.mxu1 %v2387_v37  ;;  %v2071_v37 = vmov 1966171168  }
 0x235   : > { %1872 = vmatprep.subr.bf16.mxu1 %v1871_v58  ;;  %v1452_v13 = vunpack.c.l.s4 %v2071_v37 }
 0x237   : > { %v1453_v15 = vunpack.c.0.s8 %v1452_v13 }
 0x239   : > { %v1456_v44 = vsub.s32 %v1453_v15, %v1374_v38 }
 0x23c   : > { %1874 = vmatpush3.bf16.xpose.msra.mxu1 %v2397_v61  ;;  %v1376_v61 = vrot.slane %v1371_v11, %v1375_v12 }
 0x23d   : > { %1876 = vmatprep.subr.bf16.mxu1 %v1875_v56 }
 0x244   : > { %1878 = vmatpush3.bf16.xpose.msra.mxu1 %v2395_v59 }
 0x245   : > { %1880 = vmatprep.subr.bf16.mxu1 %v1879_v9 }
 0x24c   : > { %1882 = vmatpush3.bf16.xpose.msra.mxu1 %v2405_v10 }
 0x24d   : > { %1884 = vmatprep.subr.bf16.mxu1 %v1883_v7 }
 0x254   : > { %1886 = vmatpush3.bf16.xpose.msra.mxu1 %v2403_v8 }
 0x25b   : > { %1738 = vmatmul.mubr.f32.vlgmr.msra.gmra.mrb[48].mxu1 %v2367_v14 }
 0x32e   : > { %v1443_v59 = vpop.f32.mrb[48].mxu1 }
 0x32f   : > { %v1444_v17 = vadd.f32 %v1443_v59, %v1376_v61  ;;  %v1445_v10 = vpop.f32.mrb[49].mxu1 }
 0x330   : > { %v1446_v16 = vadd.f32 %v1445_v10, %v1376_v61 }
 0x332   : > { %v1450_v8 = vcombine.low %v1444_v17, %v1446_v16 }
 0x334   : > { %v1457_v14 = vrot.slane %v1450_v8, %v1456_v44 }
 0x336   : > { %v1464_v18 = vrot.slane %v1457_v14, %v1456_v44 }
 0x338   : > { %1470 = vst.msk [vmem:[%s344_s17] sm:$0x3] %vm1468_vm3, %v1464_v18 }
 0x339   : > { %2019 = shalt.err (!%p2016_p3)
}
 0x33a   : > { %s2020_s24 = scalar_lea.hbm %s2437_s25, 32  ;;  %s2024_s8 = scalar_lea.hbm %s2488_s9, 64 }
 0x33b   : > { %p2021_p4 = scmp.ne.s32.totalorder %s2437_s25, %s2020_s24  ;;  %p2025_p9 = scmp.lt.u32.totalorder %s2437_s25, %s2488_s9 }
 0x33c   : > { %p2026_p10 = scmp.lt.u32.totalorder %s2024_s8, %s2020_s24  ;;  %p2028_p12 = scmp.lt.u32.totalorder %s2020_s24, %s2437_s25 }
 0x33d   : > { %p2022_p7 = pnand %p2021_p4, %p2161_p5 }
 0x33e   : > { %p2027_p11 = por %p2026_p10, %p2025_p9 }
 0x33f   : > { %p2023_p8 = pneg %p2022_p7 }
 0x340   : > { %p2029_p13 = por %p2028_p12, %p2027_p11 }
 0x342   : > { %p2030_p0 = pnand %p2029_p13, %p2023_p8 }
 0x344   : > { %2033 = shalt.err (!%p2030_p0)
}
 0x345   : > { %1923 = dma.vmem_to_hbm [thread:$0]  (%p2161_p5), %s2439_s15, 32, %s2437_s25, %s1472_s22  }
 0x346 PF: > { %p1929_p1 = scmp.ge.s32.totalorder %s2068_s14, 2  ;;  %s1498_s23 = sand.u32 1, %s2056_s11  }
 0x347   : > { %s1499_s26 = scalar_lea.sflag [#allocation4], %s1498_s23 }
 0x348   : > { %p1926_p2 = pnand %p1929_p1, %p2165_p6 }
 0x34a   : > { %2051 = dma.done.wait (!%p1926_p2), %s1499_s26, 32  }
 0x34b   : > { %2053 = vsyncadd (!%p1926_p2), %s1499_s26, 4294967264  ;;  %p21_p3 = scmp.ge.s32.totalorder %s2149_s16, 4   ;;  %s2491_s11 = smov %s2060_s12 }
 0x34c   : > { %s2492_s12 = smov %s2064_s13  ;;  %s2493_s13 = smov %s2159_s19 }
 0x34d   : > { %s2494_s14 = smov %s2149_s16  ;;  %23 = sbr.rel (!%p21_p3) target bundleno = 6 (0x6), region = 94 }
 0x354   :  { %1504 = vsyncpa [#allocation4], 1 }
 0x355   :  { %1506 = vsyncpa [#allocation4 + $0x1], 1 }

</bundles_post_ra>
